<compile_context>
chip_gen: v6e
topology: v6e:2x2x1
jax: 0.10.0
libtpu: 0.0.40
codegen_flags: <defaults>
</compile_context>

<pallas_src>
import functools
import math

import jax
import jax.numpy as jnp
from jax.experimental import pallas as pl
from jax.experimental.pallas import tpu as pltpu


_INV_SQRT2 = 0.7071067811865476
_SQRT_2_OVER_PI = 0.7978845608028654


def _erf_poly(z):
    """erf via Abramowitz–Stegun 7.1.26 (max abs err 1.5e-7).

    Keeps the 'exact' GELU path independent of any native erf lowering:
    only mul/add/div (VPU) + one exp (EUP) + a select.
    """
    a1, a2, a3, a4, a5 = (0.254829592, -0.284496736, 1.421413741,
                          -1.453152027, 1.061405429)
    p = 0.3275911
    az = jnp.abs(z)
    t = 1.0 / (1.0 + p * az)
    poly = ((((a5 * t + a4) * t + a3) * t + a2) * t + a1) * t
    r = 1.0 - poly * jnp.exp(-az * az)
    return jnp.where(z >= 0, r, -r)


def _gelu(h, approximate):
    if approximate:
        # tanh-approx GELU: the transcendental runs on the EUP slot (idle in
        # this kernel), relieving the VALU which otherwise saturates on the
        # erf polynomial over tm*inner elements (v6e/v7x perf-review item).
        # Deviation from torch's exact GELU is <~1e-3 pre-sigmoid.
        u = _SQRT_2_OVER_PI * (h + 0.044715 * h * h * h)
        return 0.5 * h * (1.0 + jnp.tanh(u))
    # "exact" (erf) GELU — matches torch.nn.GELU() default to ~1e-7.
    return 0.5 * h * (1.0 + _erf_poly(h * _INV_SQRT2))


def _epilogue(h, w2_ref, b2_ref, out_ref, approximate_gelu):
    h = _gelu(h, approximate_gelu)
    # N=1 projection stays OFF the MXU (a matvec would waste 255/256 MXU
    # columns): VPU multiply + cross-lane reduction (XLU), scalar bias from
    # SMEM.  The result is relaid out once per step into a lane-dense
    # (1, 1, tm) output block (unmasked stores, dense writeback DMA).
    # TODO(synk): confirm in the bundle dump that the reduction lowers to an
    # XLU reduce and not a VMEM-materializing relayout.
    g = jnp.sum(h * w2_ref[...], axis=-1) + b2_ref[0, 0]
    out_ref[...] = jax.nn.sigmoid(g).reshape(out_ref.shape).astype(out_ref.dtype)


def _update_gate_kernel_resident(x_ref, w1_ref, b1_ref, w2_ref, b2_ref, out_ref,
                                 *, cast_to_bf16, approximate_gelu):
    # x_ref:  (tm, D)    streamed token tile
    # w1_ref: (D, inner) resident, pre-transposed
    # b1_ref: (1, inner), w2_ref: (1, inner), b2_ref: (1, 1) in SMEM
    # out_ref: (1, 1, tm) lane-dense gate block
    x = x_ref[...]
    if cast_to_bf16 and x.dtype == jnp.float32:
        # bf16 MXU operands (f32 accumulation below); cast in-kernel so the
        # wrapper never makes an extra HBM pass over x.
        x = x.astype(jnp.bfloat16)
    h = jnp.dot(x, w1_ref[...], preferred_element_type=jnp.float32) + b1_ref[...]
    _epilogue(h, w2_ref, b2_ref, out_ref, approximate_gelu)


def _update_gate_kernel_ktiled(x_ref, w1_ref, b1_ref, w2_ref, b2_ref, out_ref,
                               acc_ref, *, cast_to_bf16, approximate_gelu):
    # Reduction over D split across the trailing ("arbitrary") grid axis.
    k = pl.program_id(1)

    @pl.when(k == 0)
    def _():
        acc_ref[...] = jnp.zeros_like(acc_ref)

    x = x_ref[...]
    if cast_to_bf16 and x.dtype == jnp.float32:
        x = x.astype(jnp.bfloat16)
    acc_ref[...] += jnp.dot(x, w1_ref[...], preferred_element_type=jnp.float32)

    @pl.when(k == pl.num_programs(1) - 1)
    def _():
        _epilogue(acc_ref[...] + b1_ref[...], w2_ref, b2_ref, out_ref,
                  approximate_gelu)


def _round_up(x, m):
    return (x + m - 1) // m * m


def update_gate(hidden_states, w1, b1, w2, b2, *, tm=512, tk=None,
                cast_to_bf16=True, approximate_gelu=True):
    """UpdateGate forward: sigmoid(Linear2(GELU(Linear1(x)))) -> (B, S, 1).

    hidden_states: (B, S, D); w1: (inner, D); b1: (inner,); w2: (1, inner);
    b2: (1,).  Dropout is the eval-mode no-op.

    tm: row tile (tokens per grid step); 512 default, sweep {512,1024,2048}
        on v5e/v6e (128 MiB VMEM).  Clamped for tiny inputs.
    tk: feature tile.  None = auto: keep W1 resident when it fits the
        generation-aware VMEM budget, else reduce over D with an "arbitrary"
        grid axis + f32 accumulator (required on v7x for large D*inner).
    cast_to_bf16: bf16 MXU operands (x cast in-kernel, W1 cast once in the
        wrapper); accumulation/GELU/sigmoid stay f32.  False = full f32.
    approximate_gelu: True = tanh GELU on the EUP slot (≲1e-3 deviation);
        False = erf GELU matching torch.nn.GELU() to ~1e-7.
    """
    B, S, D = hidden_states.shape
    inner = w1.shape[0]
    assert w1.shape == (inner, D)
    assert b1.shape == (inner,)
    assert w2.shape == (1, inner)
    assert b2.shape == (1,)

    M = B * S
    x2d = hidden_states.reshape(M, D)      # no pad / no cast: no extra HBM pass over x

    tm = max(8, min(int(tm), _round_up(M, 8)))
    tm = _round_up(tm, 8)

    w_dtype = jnp.bfloat16 if cast_to_bf16 else w1.dtype
    w1_t = w1.T.astype(w_dtype)            # (D, inner); one-time cast of the weight
    b1_r = b1.reshape(1, inner).astype(jnp.float32)
    w2_r = w2.reshape(1, inner).astype(jnp.float32)
    b2_r = b2.reshape(1, 1).astype(jnp.float32)
    out_dtype = hidden_states.dtype

    # Generation-aware VMEM budget (v5e/v6e: 128 MiB, v7x: 64 MiB per TC);
    # 15% headroom for compiler-internal scratch / semaphores.
    try:
        vmem_cap = int(pltpu.get_tpu_info().vmem_capacity_bytes)
    except Exception:
        vmem_cap = 64 << 20
    vmem_budget = int(vmem_cap * 0.85)

    x_item = x2d.dtype.itemsize
    w_item = jnp.dtype(w_dtype).itemsize
    out_item = jnp.dtype(out_dtype).itemsize

    def vmem_need(tm_, tk_):
        ktiled = tk_ != D
        need = 2 * tm_ * tk_ * x_item                         # double-buffered x tile
        need += (2 if ktiled else 1) * tk_ * inner * w_item   # W1 (resident => Buffered(1))
        need += (tm_ * inner * 4) if ktiled else 0            # f32 accumulator scratch
        need += 3 * tm_ * inner * 4                           # h + GELU temporaries (f32)
        need += 2 * 8 * inner * 4                             # b1 / w2 rows (sublane-padded)
        need += 2 * 8 * tm_ * out_item                        # out blocks (sublane-padded)
        return need

    if tk is None:
        tk = D
        if vmem_need(tm, D) > vmem_budget:
            for cand in (2048, 1024, 512, 256, 128):
                if cand < D and D % cand == 0:
                    tk = cand
                    break
            # TODO(synk): if D has no multiple-of-128 divisor, W1 stays
            # resident and only tm shrinks below.
    tk = int(tk)
    assert tk <= D and D % tk == 0, "tk must divide D"
    assert tk == D or tk % 128 == 0, "partial feature tiles must be lane-aligned"

    while vmem_need(tm, tk) > vmem_budget and tm > 128:
        tm = max(128, tm // 2)                 # stays a multiple of 8

    use_ktiled = tk != D
    num_tiles = pl.cdiv(M, tm)
    vmem_limit = int(min(max(vmem_need(tm, tk) * 13 // 10 + (1 << 20), 16 << 20),
                         vmem_budget))

    kernel = functools.partial(
        _update_gate_kernel_ktiled if use_ktiled else _update_gate_kernel_resident,
        cast_to_bf16=cast_to_bf16, approximate_gelu=approximate_gelu)

    def _run(single_buffer_constants):
        if single_buffer_constants and hasattr(pl, "Buffered"):
            def const_spec(bs, im):
                # Constant-index blocks: a second, never-refilled buffer is
                # pure VMEM waste — single-buffer halves W1's footprint.
                return pl.BlockSpec(bs, im, pipeline_mode=pl.Buffered(1))
        else:
            const_spec = pl.BlockSpec

        if use_ktiled:
            in_specs = [
                pl.BlockSpec((tm, tk), lambda i, k: (i, k)),         # x (streamed)
                pl.BlockSpec((tk, inner), lambda i, k: (k, 0)),      # W1^T K-slab
                const_spec((1, inner), lambda i, k: (0, 0)),         # b1
                const_spec((1, inner), lambda i, k: (0, 0)),         # w2 row
                pl.BlockSpec(memory_space=pltpu.MemorySpace.SMEM),   # b2 scalar
            ]
            out_specs = pl.BlockSpec((1, 1, tm), lambda i, k: (i, 0, 0))
            grid = (num_tiles, D // tk)
            scratch = [pltpu.VMEM((tm, inner), jnp.float32)]
            dim_sem = ("parallel", "arbitrary")
        else:
            in_specs = [
                pl.BlockSpec((tm, D), lambda i: (i, 0)),             # x (streamed)
                const_spec((D, inner), lambda i: (0, 0)),            # W1^T resident
                const_spec((1, inner), lambda i: (0, 0)),            # b1
                const_spec((1, inner), lambda i: (0, 0)),            # w2 row
                pl.BlockSpec(memory_space=pltpu.MemorySpace.SMEM),   # b2 scalar
            ]
            out_specs = pl.BlockSpec((1, 1, tm), lambda i: (i, 0, 0))
            grid = (num_tiles,)
            scratch = []
            dim_sem = ("parallel",)

        return pl.pallas_call(
            kernel,
            out_shape=jax.ShapeDtypeStruct((num_tiles, 1, tm), out_dtype),
            grid=grid,
            in_specs=in_specs,
            out_specs=out_specs,
            scratch_shapes=scratch,
            compiler_params=pltpu.CompilerParams(
                dimension_semantics=dim_sem,
                vmem_limit_bytes=vmem_limit),
        )(x2d, w1_t, b1_r, w2_r, b2_r)

    try:
        out = _run(single_buffer_constants=True)
    except Exception:
        # Fallback for jax versions without BlockSpec(pipeline_mode=Buffered).
        out = _run(single_buffer_constants=False)

    # Lane-dense (num_tiles, 1, tm) gate -> (B, S, 1); garbage rows from the
    # ragged last row-block (if any) are sliced away here.
    return out.reshape(-1)[:M].reshape(B, S, 1)


def update_gate_ref(hidden_states, w1, b1, w2, b2, *, approximate_gelu=False):
    """Pure-JAX (XLA, no Pallas) reference for correctness checking."""
    h = hidden_states @ w1.T + b1
    if approximate_gelu:
        h = 0.5 * h * (1.0 + jnp.tanh(_SQRT_2_OVER_PI * (h + 0.044715 * h ** 3)))
    else:
        h = 0.5 * h * (1.0 + jax.lax.erf(h * _INV_SQRT2))
    g = h @ w2.T + b2
    return jax.nn.sigmoid(g)


if __name__ == "__main__":
    key = jax.random.PRNGKey(0)

    def make_params(k, D, inner):
        kw1, kb1, kw2, kb2 = jax.random.split(k, 4)
        bound1 = 1.0 / math.sqrt(D)
        w1 = jax.random.uniform(kw1, (inner, D), minval=-bound1, maxval=bound1,
                                dtype=jnp.float32)
        b1 = jax.random.uniform(kb1, (inner,), minval=-bound1, maxval=bound1,
                                dtype=jnp.float32)
        bound2 = 1.0 / math.sqrt(inner)
        w2 = jax.random.uniform(kw2, (1, inner), minval=-bound2, maxval=bound2,
                                dtype=jnp.float32)
        b2 = jax.random.uniform(kb2, (1,), minval=-bound2, maxval=bound2,
                                dtype=jnp.float32)
        return w1, b1, w2, b2

    # ---- case 1: small shapes, resident-W1 path --------------------------
    B, S, D = 2, 8, 32
    inner = D        # module is only well-defined when inner_dim == input_dim
    k1, k2, key = jax.random.split(key, 3)
    x = jax.random.normal(k1, (B, S, D), dtype=jnp.float32)
    w1, b1, w2, b2 = make_params(k2, D, inner)

    ref_exact = update_gate_ref(x, w1, b1, w2, b2, approximate_gelu=False)
    ref_tanh = update_gate_ref(x, w1, b1, w2, b2, approximate_gelu=True)

    # exact-GELU, f32 MXU: matches the PyTorch module numerics.
    g_exact = jax.block_until_ready(update_gate(x, w1, b1, w2, b2,
                                                cast_to_bf16=False,
                                                approximate_gelu=False))
    assert g_exact.shape == (B, S, 1)
    assert jnp.allclose(g_exact, ref_exact, atol=1e-4, rtol=1e-4), \
        "exact f32 path mismatch vs reference"

    # default fast path: bf16 MXU operands + tanh GELU (EUP).
    g_fast = jax.block_until_ready(update_gate(x, w1, b1, w2, b2))
    assert g_fast.shape == (B, S, 1)
    assert jnp.allclose(g_fast, ref_tanh, atol=5e-2), "bf16/tanh path mismatch"
    assert jnp.allclose(g_fast, ref_exact, atol=5e-2), "bf16/tanh vs exact mismatch"

    # ---- case 2: ragged token count + K-tiled reduction over D -----------
    B2, S2, D2 = 2, 10, 256          # M = 20: not a multiple of the row tile
    inner2 = D2
    k3, k4, key = jax.random.split(key, 3)
    x2 = jax.random.normal(k3, (B2, S2, D2), dtype=jnp.float32)
    w1b, b1b, w2b, b2b = make_params(k4, D2, inner2)

    ref2 = update_gate_ref(x2, w1b, b1b, w2b, b2b, approximate_gelu=False)
    g2 = jax.block_until_ready(update_gate(x2, w1b, b1b, w2b, b2b, tk=128,
                                           cast_to_bf16=False,
                                           approximate_gelu=False))
    assert g2.shape == (B2, S2, 1)
    assert jnp.allclose(g2, ref2, atol=1e-4, rtol=1e-4), \
        "K-tiled path mismatch vs reference"

    print("KERNEL_OK")
</pallas_src>

<mosaic_0001>
module attributes {stable_mosaic.version = 11 : i64} {
  func.func @_update_gate_kernel_resident(%arg0: i32, %arg1: memref<16x32xf32, #tpu.memory_space<vmem>>, %arg2: memref<32x32xf32, #tpu.memory_space<vmem>>, %arg3: memref<1x32xf32, #tpu.memory_space<vmem>>, %arg4: memref<1x32xf32, #tpu.memory_space<vmem>>, %arg5: memref<1x1xf32, #tpu.memory_space<smem>>, %arg6: memref<1x1x16xf32, #tpu.memory_space<vmem>>) attributes {dimension_semantics = [#tpu.dimension_semantics<parallel>], iteration_bounds = array<i64: 1>, scalar_prefetch = 0 : i64, scratch_operands = 0 : i64, tpu.core_type = #tpu.core_type<tc>, window_params = [{transform_indices = @transform_0, window_bounds = array<i64: 16, 32>}, {pipeline_mode = #tpu.pipeline_mode<synchronous>, transform_indices = @transform_1, window_bounds = array<i64: 32, 32>}, {pipeline_mode = #tpu.pipeline_mode<synchronous>, transform_indices = @transform_2, window_bounds = array<i64: 1, 32>}, {pipeline_mode = #tpu.pipeline_mode<synchronous>, transform_indices = @transform_3, window_bounds = array<i64: 1, 32>}, {transform_indices = @transform_4, window_bounds = array<i64: 1, 1>}, {transform_indices = @transform_5, window_bounds = array<i64: 1, 1, 16>}]} {
    %c0 = arith.constant 0 : index
    %c0_0 = arith.constant 0 : index
    %0 = vector.load %arg1[%c0, %c0_0] : memref<16x32xf32, #tpu.memory_space<vmem>>, vector<16x32xf32>
    %c0_1 = arith.constant 0 : index
    %c0_2 = arith.constant 0 : index
    %1 = vector.load %arg2[%c0_1, %c0_2] : memref<32x32xf32, #tpu.memory_space<vmem>>, vector<32x32xf32>
    %cst = arith.constant dense<0.000000e+00> : vector<16x32xf32>
    %2 = tpu.matmul %0, %1, %cst {dimension_numbers = #tpu.dot_dimension_numbers<[1], [0], [0], [1], [0, 0, 1, 1], [], []>} : vector<16x32xf32>, vector<32x32xf32>, vector<16x32xf32> -> vector<16x32xf32>
    %c0_3 = arith.constant 0 : index
    %c0_4 = arith.constant 0 : index
    %3 = vector.load %arg3[%c0_3, %c0_4] : memref<1x32xf32, #tpu.memory_space<vmem>>, vector<1x32xf32>
    %4 = vector.broadcast %3 : vector<1x32xf32> to vector<16x32xf32>
    %5 = arith.addf %2, %4 : vector<16x32xf32>
    %cst_5 = arith.constant 5.000000e-01 : f32
    %6 = vector.broadcast %cst_5 : f32 to vector<16x32xf32>
    %7 = arith.mulf %6, %5 : vector<16x32xf32>
    %cst_6 = arith.constant 0.707106769 : f32
    %8 = vector.broadcast %cst_6 : f32 to vector<16x32xf32>
    %9 = arith.mulf %5, %8 : vector<16x32xf32>
    %10 = math.absf %9 : vector<16x32xf32>
    %cst_7 = arith.constant 0.327591091 : f32
    %11 = vector.broadcast %cst_7 : f32 to vector<16x32xf32>
    %12 = arith.mulf %11, %10 : vector<16x32xf32>
    %cst_8 = arith.constant 1.000000e+00 : f32
    %13 = vector.broadcast %cst_8 : f32 to vector<16x32xf32>
    %14 = arith.addf %13, %12 : vector<16x32xf32>
    %cst_9 = arith.constant 1.000000e+00 : f32
    %15 = vector.broadcast %cst_9 : f32 to vector<16x32xf32>
    %16 = arith.divf %15, %14 : vector<16x32xf32>
    %cst_10 = arith.constant 1.06140542 : f32
    %17 = vector.broadcast %cst_10 : f32 to vector<16x32xf32>
    %18 = arith.mulf %17, %16 : vector<16x32xf32>
    %cst_11 = arith.constant -1.45315206 : f32
    %19 = vector.broadcast %cst_11 : f32 to vector<16x32xf32>
    %20 = arith.addf %18, %19 : vector<16x32xf32>
    %21 = arith.mulf %20, %16 : vector<16x32xf32>
    %cst_12 = arith.constant 1.42141378 : f32
    %22 = vector.broadcast %cst_12 : f32 to vector<16x32xf32>
    %23 = arith.addf %21, %22 : vector<16x32xf32>
    %24 = arith.mulf %23, %16 : vector<16x32xf32>
    %cst_13 = arith.constant -0.284496725 : f32
    %25 = vector.broadcast %cst_13 : f32 to vector<16x32xf32>
    %26 = arith.addf %24, %25 : vector<16x32xf32>
    %27 = arith.mulf %26, %16 : vector<16x32xf32>
    %cst_14 = arith.constant 0.254829586 : f32
    %28 = vector.broadcast %cst_14 : f32 to vector<16x32xf32>
    %29 = arith.addf %27, %28 : vector<16x32xf32>
    %30 = arith.mulf %29, %16 : vector<16x32xf32>
    %cst_15 = arith.constant 0.000000e+00 : f32
    %31 = vector.broadcast %cst_15 : f32 to vector<16x32xf32>
    %32 = arith.subf %31, %10 : vector<16x32xf32>
    %33 = arith.mulf %32, %10 : vector<16x32xf32>
    %34 = math.exp %33 : vector<16x32xf32>
    %35 = arith.mulf %30, %34 : vector<16x32xf32>
    %cst_16 = arith.constant 1.000000e+00 : f32
    %36 = vector.broadcast %cst_16 : f32 to vector<16x32xf32>
    %37 = arith.subf %36, %35 : vector<16x32xf32>
    %cst_17 = arith.constant 0.000000e+00 : f32
    %38 = vector.broadcast %cst_17 : f32 to vector<16x32xf32>
    %39 = arith.cmpf oge, %9, %38 : vector<16x32xf32>
    %cst_18 = arith.constant 0.000000e+00 : f32
    %40 = vector.broadcast %cst_18 : f32 to vector<16x32xf32>
    %41 = arith.subf %40, %37 : vector<16x32xf32>
    %42 = arith.select %39, %37, %41 : vector<16x32xi1>, vector<16x32xf32>
    %cst_19 = arith.constant 1.000000e+00 : f32
    %43 = vector.broadcast %cst_19 : f32 to vector<16x32xf32>
    %44 = arith.addf %43, %42 : vector<16x32xf32>
    %45 = arith.mulf %7, %44 : vector<16x32xf32>
    %c0_20 = arith.constant 0 : index
    %c0_21 = arith.constant 0 : index
    %46 = vector.load %arg4[%c0_20, %c0_21] : memref<1x32xf32, #tpu.memory_space<vmem>>, vector<1x32xf32>
    %47 = vector.broadcast %46 : vector<1x32xf32> to vector<16x32xf32>
    %48 = arith.mulf %45, %47 : vector<16x32xf32>
    %cst_22 = arith.constant dense<0.000000e+00> : vector<16xf32>
    %49 = vector.multi_reduction <add>, %48, %cst_22 [1] : vector<16x32xf32> to vector<16xf32>
    %c0_23 = arith.constant 0 : index
    %c0_24 = arith.constant 0 : index
    %50 = memref.load %arg5[%c0_23, %c0_24] : memref<1x1xf32, #tpu.memory_space<smem>>
    %51 = vector.broadcast %50 : f32 to vector<16xf32>
    %52 = arith.addf %49, %51 : vector<16xf32>
    %53 = arith.negf %52 : vector<16xf32>
    %54 = math.exp %53 : vector<16xf32>
    %cst_25 = arith.constant 1.000000e+00 : f32
    %55 = vector.broadcast %cst_25 : f32 to vector<16xf32>
    %56 = arith.addf %55, %54 : vector<16xf32>
    %57 = arith.divf %55, %56 : vector<16xf32>
    %58 = vector.shape_cast %57 : vector<16xf32> to vector<1x1x16xf32>
    %c0_26 = arith.constant 0 : index
    %c0_27 = arith.constant 0 : index
    %c0_28 = arith.constant 0 : index
    %59 = vector.load %arg6[%c0_26, %c0_27, %c0_28] : memref<1x1x16xf32, #tpu.memory_space<vmem>>, vector<1x1x16xf32>
    tpu.vector_store %arg6[%c0_26, %c0_27, %c0_28], %58 {strides = array<i32>} : memref<1x1x16xf32, #tpu.memory_space<vmem>>, vector<1x1x16xf32>,
    return
  }
  func.func @transform_0(%arg0: i32) -> (i32, i32) {
    %c0_i32 = arith.constant 0 : i32
    %c0_i32_0 = arith.constant 0 : i32
    return %arg0, %c0_i32 : i32, i32
  }
  func.func @transform_1(%arg0: i32) -> (i32, i32) {
    %c0_i32 = arith.constant 0 : i32
    %c0_i32_0 = arith.constant 0 : i32
    %c0_i32_1 = arith.constant 0 : i32
    return %c0_i32, %c0_i32_0 : i32, i32
  }
  func.func @transform_2(%arg0: i32) -> (i32, i32) {
    %c0_i32 = arith.constant 0 : i32
    %c0_i32_0 = arith.constant 0 : i32
    %c0_i32_1 = arith.constant 0 : i32
    return %c0_i32, %c0_i32_0 : i32, i32
  }
  func.func @transform_3(%arg0: i32) -> (i32, i32) {
    %c0_i32 = arith.constant 0 : i32
    %c0_i32_0 = arith.constant 0 : i32
    %c0_i32_1 = arith.constant 0 : i32
    return %c0_i32, %c0_i32_0 : i32, i32
  }
  func.func @transform_4(%arg0: i32) -> (i32, i32) {
    %c0_i32 = arith.constant 0 : i32
    %c0_i32_0 = arith.constant 0 : i32
    %c0_i32_1 = arith.constant 0 : i32
    return %c0_i32, %c0_i32_0 : i32, i32
  }
  func.func @transform_5(%arg0: i32) -> (i32, i32, i32) {
    %c0_i32 = arith.constant 0 : i32
    %c0_i32_0 = arith.constant 0 : i32
    %c0_i32_1 = arith.constant 0 : i32
    return %arg0, %c0_i32, %c0_i32_0 : i32, i32, i32
  }
}

module attributes {stable_mosaic.version = 11 : i64} {
  func.func @_update_gate_kernel_resident(%arg0: i32, %arg1: memref<16x32xf32, #tpu.memory_space<vmem>>, %arg2: memref<32x32xf32, #tpu.memory_space<vmem>>, %arg3: memref<1x32xf32, #tpu.memory_space<vmem>>, %arg4: memref<1x32xf32, #tpu.memory_space<vmem>>, %arg5: memref<1x1xf32, #tpu.memory_space<smem>>, %arg6: memref<1x1x16xf32, #tpu.memory_space<vmem>>) attributes {dimension_semantics = [#tpu.dimension_semantics<parallel>], iteration_bounds = array<i64: 1>, scalar_prefetch = 0 : i64, scratch_operands = 0 : i64, tpu.core_type = #tpu.core_type<tc>, window_params = [{transform_indices = @transform_0, window_bounds = array<i64: 16, 32>}, {pipeline_mode = #tpu.pipeline_mode<synchronous>, transform_indices = @transform_1, window_bounds = array<i64: 32, 32>}, {pipeline_mode = #tpu.pipeline_mode<synchronous>, transform_indices = @transform_2, window_bounds = array<i64: 1, 32>}, {pipeline_mode = #tpu.pipeline_mode<synchronous>, transform_indices = @transform_3, window_bounds = array<i64: 1, 32>}, {transform_indices = @transform_4, window_bounds = array<i64: 1, 1>}, {transform_indices = @transform_5, window_bounds = array<i64: 1, 1, 16>}]} {
    %c0 = arith.constant 0 : index
    %c0_0 = arith.constant 0 : index
    %0 = vector.load %arg1[%c0, %c0_0] : memref<16x32xf32, #tpu.memory_space<vmem>>, vector<16x32xf32>
    %c0_1 = arith.constant 0 : index
    %c0_2 = arith.constant 0 : index
    %1 = vector.load %arg2[%c0_1, %c0_2] : memref<32x32xf32, #tpu.memory_space<vmem>>, vector<32x32xf32>
    %cst = arith.constant dense<0.000000e+00> : vector<16x32xf32>
    %2 = tpu.matmul %0, %1, %cst {dimension_numbers = #tpu.dot_dimension_numbers<[1], [0], [0], [1], [0, 0, 1, 1], [], []>} : vector<16x32xf32>, vector<32x32xf32>, vector<16x32xf32> -> vector<16x32xf32>
    %c0_3 = arith.constant 0 : index
    %c0_4 = arith.constant 0 : index
    %3 = vector.load %arg3[%c0_3, %c0_4] : memref<1x32xf32, #tpu.memory_space<vmem>>, vector<1x32xf32>
    %4 = vector.broadcast %3 : vector<1x32xf32> to vector<16x32xf32>
    %5 = arith.addf %2, %4 : vector<16x32xf32>
    %cst_5 = arith.constant 5.000000e-01 : f32
    %6 = vector.broadcast %cst_5 : f32 to vector<16x32xf32>
    %7 = arith.mulf %6, %5 : vector<16x32xf32>
    %cst_6 = arith.constant 0.707106769 : f32
    %8 = vector.broadcast %cst_6 : f32 to vector<16x32xf32>
    %9 = arith.mulf %5, %8 : vector<16x32xf32>
    %10 = math.absf %9 : vector<16x32xf32>
    %cst_7 = arith.constant 0.327591091 : f32
    %11 = vector.broadcast %cst_7 : f32 to vector<16x32xf32>
    %12 = arith.mulf %11, %10 : vector<16x32xf32>
    %cst_8 = arith.constant 1.000000e+00 : f32
    %13 = vector.broadcast %cst_8 : f32 to vector<16x32xf32>
    %14 = arith.addf %13, %12 : vector<16x32xf32>
    %cst_9 = arith.constant 1.000000e+00 : f32
    %15 = vector.broadcast %cst_9 : f32 to vector<16x32xf32>
    %16 = arith.divf %15, %14 : vector<16x32xf32>
    %cst_10 = arith.constant 1.06140542 : f32
    %17 = vector.broadcast %cst_10 : f32 to vector<16x32xf32>
    %18 = arith.mulf %17, %16 : vector<16x32xf32>
    %cst_11 = arith.constant -1.45315206 : f32
    %19 = vector.broadcast %cst_11 : f32 to vector<16x32xf32>
    %20 = arith.addf %18, %19 : vector<16x32xf32>
    %21 = arith.mulf %20, %16 : vector<16x32xf32>
    %cst_12 = arith.constant 1.42141378 : f32
    %22 = vector.broadcast %cst_12 : f32 to vector<16x32xf32>
    %23 = arith.addf %21, %22 : vector<16x32xf32>
    %24 = arith.mulf %23, %16 : vector<16x32xf32>
    %cst_13 = arith.constant -0.284496725 : f32
    %25 = vector.broadcast %cst_13 : f32 to vector<16x32xf32>
    %26 = arith.addf %24, %25 : vector<16x32xf32>
    %27 = arith.mulf %26, %16 : vector<16x32xf32>
    %cst_14 = arith.constant 0.254829586 : f32
    %28 = vector.broadcast %cst_14 : f32 to vector<16x32xf32>
    %29 = arith.addf %27, %28 : vector<16x32xf32>
    %30 = arith.mulf %29, %16 : vector<16x32xf32>
    %cst_15 = arith.constant 0.000000e+00 : f32
    %31 = vector.broadcast %cst_15 : f32 to vector<16x32xf32>
    %32 = arith.subf %31, %10 : vector<16x32xf32>
    %33 = arith.mulf %32, %10 : vector<16x32xf32>
    %34 = math.exp %33 : vector<16x32xf32>
    %35 = arith.mulf %30, %34 : vector<16x32xf32>
    %cst_16 = arith.constant 1.000000e+00 : f32
    %36 = vector.broadcast %cst_16 : f32 to vector<16x32xf32>
    %37 = arith.subf %36, %35 : vector<16x32xf32>
    %cst_17 = arith.constant 0.000000e+00 : f32
    %38 = vector.broadcast %cst_17 : f32 to vector<16x32xf32>
    %39 = arith.cmpf oge, %9, %38 : vector<16x32xf32>
    %cst_18 = arith.constant 0.000000e+00 : f32
    %40 = vector.broadcast %cst_18 : f32 to vector<16x32xf32>
    %41 = arith.subf %40, %37 : vector<16x32xf32>
    %42 = arith.select %39, %37, %41 : vector<16x32xi1>, vector<16x32xf32>
    %cst_19 = arith.constant 1.000000e+00 : f32
    %43 = vector.broadcast %cst_19 : f32 to vector<16x32xf32>
    %44 = arith.addf %43, %42 : vector<16x32xf32>
    %45 = arith.mulf %7, %44 : vector<16x32xf32>
    %c0_20 = arith.constant 0 : index
    %c0_21 = arith.constant 0 : index
    %46 = vector.load %arg4[%c0_20, %c0_21] : memref<1x32xf32, #tpu.memory_space<vmem>>, vector<1x32xf32>
    %47 = vector.broadcast %46 : vector<1x32xf32> to vector<16x32xf32>
    %48 = arith.mulf %45, %47 : vector<16x32xf32>
    %cst_22 = arith.constant dense<0.000000e+00> : vector<16xf32>
    %49 = vector.multi_reduction <add>, %48, %cst_22 [1] : vector<16x32xf32> to vector<16xf32>
    %c0_23 = arith.constant 0 : index
    %c0_24 = arith.constant 0 : index
    %50 = memref.load %arg5[%c0_23, %c0_24] : memref<1x1xf32, #tpu.memory_space<smem>>
    %51 = vector.broadcast %50 : f32 to vector<16xf32>
    %52 = arith.addf %49, %51 : vector<16xf32>
    %53 = arith.negf %52 : vector<16xf32>
    %54 = math.exp %53 : vector<16xf32>
    %cst_25 = arith.constant 1.000000e+00 : f32
    %55 = vector.broadcast %cst_25 : f32 to vector<16xf32>
    %56 = arith.addf %55, %54 : vector<16xf32>
    %57 = arith.divf %55, %56 : vector<16xf32>
    %58 = vector.shape_cast %57 : vector<16xf32> to vector<1x1x16xf32>
    %c0_26 = arith.constant 0 : index
    %c0_27 = arith.constant 0 : index
    %c0_28 = arith.constant 0 : index
    %59 = vector.load %arg6[%c0_26, %c0_27, %c0_28] : memref<1x1x16xf32, #tpu.memory_space<vmem>>, vector<1x1x16xf32>
    tpu.vector_store %arg6[%c0_26, %c0_27, %c0_28], %58 {strides = array<i32>} : memref<1x1x16xf32, #tpu.memory_space<vmem>>, vector<1x1x16xf32>,
    return
  }
  func.func @transform_0(%arg0: i32) -> (i32, i32) {
    %c0_i32 = arith.constant 0 : i32
    %c0_i32_0 = arith.constant 0 : i32
    return %arg0, %c0_i32 : i32, i32
  }
  func.func @transform_1(%arg0: i32) -> (i32, i32) {
    %c0_i32 = arith.constant 0 : i32
    %c0_i32_0 = arith.constant 0 : i32
    %c0_i32_1 = arith.constant 0 : i32
    return %c0_i32, %c0_i32_0 : i32, i32
  }
  func.func @transform_2(%arg0: i32) -> (i32, i32) {
    %c0_i32 = arith.constant 0 : i32
    %c0_i32_0 = arith.constant 0 : i32
    %c0_i32_1 = arith.constant 0 : i32
    return %c0_i32, %c0_i32_0 : i32, i32
  }
  func.func @transform_3(%arg0: i32) -> (i32, i32) {
    %c0_i32 = arith.constant 0 : i32
    %c0_i32_0 = arith.constant 0 : i32
    %c0_i32_1 = arith.constant 0 : i32
    return %c0_i32, %c0_i32_0 : i32, i32
  }
  func.func @transform_4(%arg0: i32) -> (i32, i32) {
    %c0_i32 = arith.constant 0 : i32
    %c0_i32_0 = arith.constant 0 : i32
    %c0_i32_1 = arith.constant 0 : i32
    return %c0_i32, %c0_i32_0 : i32, i32
  }
  func.func @transform_5(%arg0: i32) -> (i32, i32, i32) {
    %c0_i32 = arith.constant 0 : i32
    %c0_i32_0 = arith.constant 0 : i32
    %c0_i32_1 = arith.constant 0 : i32
    return %arg0, %c0_i32, %c0_i32_0 : i32, i32, i32
  }
}

</mosaic_0001>

<bundles_post_ra>
// kernel: tpu_custom_call.1
= control target key start
LH: loop header
LB: loop body
LE: loop exit
PB: predicated region body
PF: predicated region fallthrough
CT: control target
= control target key end

     0   :  { %11 = vsyncpa [#allocation4], 0  ;;  %s431_s0 = inlined_call_operand.hbm [shape: f32[16,32], index: 0, kind: input, shape index: {}]   ;;  %s432_s1 = inlined_call_operand.hbm [shape: f32[32,32], index: 1, kind: input, shape index: {}]   ;;  %s433_s2 = inlined_call_operand.vmem [shape: f32[1,32], index: 2, kind: input, shape index: {}]   ;;  %s434_s3 = inlined_call_operand.vmem [shape: f32[1,32], index: 3, kind: input, shape index: {}]   ;;  %s435_s4 = inlined_call_operand.<no memory space> [shape: f32[1,1], index: 4, kind: input, shape index: {}]   ;;  %s436_s5 = inlined_call_operand.hbm [shape: f32[1,1,16], index: 5, kind: output, shape index: {}]  }
   0x1   :  { %12 = vsyncpa [#allocation7], 0 }
   0x2   :  { %13 = vsyncpa [#allocation5], 0  ;;  %s374_s18 = smov [#allocation3]  }
   0x3   :  { %s19_s19 = sshll.u32 %s374_s18, 4  ;;  %s20_s19 = int_to_ptr.vmem [resolvable:$true] %s19_s19 }
   0x4   :  { %s316_s20 = scalar_lea.vmem %s20_s19, 256  ;;  %p321_p1 = scmp.lt.s32.totalorder %s20_s19, %s20_s19 }
   0x5   :  { %p317_p0 = scmp.ne.s32.totalorder %s20_s19, %s316_s20  ;;  %p322_p2 = scmp.lt.s32.totalorder %s316_s20, %s316_s20 }
   0x7   :  { %p323_p3 = por %p322_p2, %p321_p1 }
   0x9   :  { %p324_p4 = pnand %p323_p3, %p317_p0 }
   0xb   :  { %327 = shalt.err (!%p324_p4)
}
   0xc   :  { %s375_s21 = smov 128   ;;  %s376_s22 = smov 8  }
   0xd   :  { %25 = dma.hbm_to_vmem [thread:$0]  %s431_s0, 256, %s20_s19, [#allocation4], %s375_s21, %s375_s21, %s376_s22  }
   0xe   :  { %s377_s25 = smov [#allocation6]  }
   0xf   :  { %s31_s26 = sshll.u32 %s377_s25, 4  ;;  %s32_s26 = int_to_ptr.vmem [resolvable:$true] %s31_s26 }
  0x10   :  { %s336_s27 = scalar_lea.vmem %s32_s26, 512  ;;  %p341_p6 = scmp.lt.s32.totalorder %s32_s26, %s32_s26 }
  0x11   :  { %p337_p5 = scmp.ne.s32.totalorder %s32_s26, %s336_s27  ;;  %p342_p7 = scmp.lt.s32.totalorder %s336_s27, %s336_s27 }
  0x13   :  { %p343_p8 = por %p342_p7, %p341_p6 }
  0x15   :  { %p344_p9 = pnand %p343_p8, %p337_p5 }
  0x17   :  { %347 = shalt.err (!%p344_p9)
}
  0x18   :  { %37 = dma.hbm_to_vmem [thread:$0]  %s432_s1, 512, %s32_s26, [#allocation7], %s375_s21, %s375_s21, %s376_s22  }
  0x19   :  { %368 = dma.done.wait [#allocation4], 256  }
  0x1a   :  { %369 = vsyncadd [#allocation4], 4294967040 }
  0x1b   :  { %370 = dma.done.wait [#allocation7], 512  }
  0x1c   :  { %371 = vsyncadd [#allocation7], 4294966784  ;;  %vm63_vm0 = vcmask 261120   ;;  %v55_v0 = vld [vmem:[#allocation6 + $0x18] sm:$0xff]  ;;  %v54_v1 = vld [vmem:[#allocation6 + $0x10] sm:$0xff]  ;;  %vm243_vm3 = vcmask 130112  }
  0x1d   :  { %276 = vmatprep.subr.mxu0 %v55_v0  ;;  %v50_v2 = vld [vmem:[#allocation3] sm:$0xff]  ;;  %v53_v3 = vld [vmem:[#allocation6 + $0x8] sm:$0xff]  ;;  %v52_v4 = vld [vmem:[#allocation6] sm:$0xff]  ;;  %vm246_vm4 = vcmask 122880  }
  0x1e   :  { %277 = vmatpush3.msra.mxu0 %v55_v0  ;;  %284 = vmatprep.mubr.msk.f32.mxu0 %vm63_vm0, %v50_v2  ;;  %v51_v5 = vld [vmem:[#allocation3 + $0x8] sm:$0xff]  ;;  %v264_v6 = vld [vmem:[%s433_s2] ss:$0 sm:$0xff]  ;;  %v215_v2 = vstv %s435_s4 }
  0x1f   :  { %278 = vmatprep.subr.mxu0 %v54_v1  ;;  %v267_v61 = vld [vmem:[%s434_s3] ss:$0 sm:$0xff]  ;;  %s378_s3 = smov [#allocation8]  }
  0x20   :  { %279 = vmatpush3.msra.mxu0 %v54_v1  ;;  %s254_s4 = sshll.u32 %s378_s3, 4  ;;  %s255_s4 = int_to_ptr.vmem [resolvable:$true] %s254_s4 }
  0x21   :  { %280 = vmatprep.subr.mxu0 %v53_v3  ;;  %s348_s8 = scalar_lea.vmem %s255_s4, 16  ;;  %s352_s9 = scalar_lea.vmem %s255_s4, 32 }
  0x22   :  { %281 = vmatpush3.msra.mxu0 %v53_v3  ;;  %p349_p10 = scmp.ne.s32.totalorder %s255_s4, %s348_s8  ;;  %p353_p11 = scmp.lt.s32.totalorder %s255_s4, %s255_s4 }
  0x23   :  { %282 = vmatprep.subr.mxu0 %v52_v4  ;;  %p354_p12 = scmp.lt.s32.totalorder %s352_s9, %s348_s8 }
  0x24   :  { %283 = vmatpush3.msra.mxu0 %v52_v4 }
  0x25   :  { %285 = vmatmul.mubr.msk.f32.vlgmr.msra.gmra.mxu0 %vm63_vm0, %v51_v5  ;;  %p355_p13 = por %p354_p12, %p353_p11 }
  0x27   :  { %p356_p0 = pnand %p355_p13, %p349_p10 }
  0xe5   :  { %v286_v7 = vpop.f32.mrf.mxu0 }
  0xe6   :  { %v142_v8 = vadd.f32 %v286_v7, %v264_v6 }
  0xe7   :  { %v136_v9 = vpop.f32.mrf.mxu0 }
  0xe8   :  { %v148_v10 = vmul.f32 0.70710677, %v142_v8  ;;  %v137_v11 = vadd.f32 %v264_v6, %v136_v9  ;;  %v146_v56 = vmul.f32 0.5, %v142_v8 }
  0xea   :  { %v150_v12 = vand.u32 2147483647, %v148_v10  ;;  %v147_v13 = vmul.f32 0.70710677, %v137_v11  ;;  %vm190_vm1 = vcmp.ge.f32.partialorder %v148_v10, 0.0  ;;  %v145_v57 = vmul.f32 0.5, %v137_v11 }
  0xec   :  { %v152_v14 = vmul.f32 0.3275911, %v150_v12  ;;  %v149_v15 = vand.u32 2147483647, %v147_v13  ;;  %v178_v19 = vsub.f32 0.0, %v150_v12  ;;  %vm189_vm2 = vcmp.ge.f32.partialorder %v147_v13, 0.0 }
  0xed   :  { %v232_v13 = vlaneseq }
  0xee   :  { %v154_v16 = vadd.f32 1.0, %v152_v14  ;;  %v151_v17 = vmul.f32 0.3275911, %v149_v15  ;;  %v177_v20 = vsub.f32 0.0, %v149_v15  ;;  %v180_v21 = vmul.f32 %v178_v19, %v150_v12 }
  0xef   :  { %v233_v14 = vand.u32 127, %v232_v13 }
  0xf0   :  { %292 = vrcp.f32 %v154_v16  ;;  %v153_v18 = vadd.f32 1.0, %v151_v17  ;;  %v179_v23 = vmul.f32 %v177_v20, %v149_v15  ;;  %v183_v24 = vmul.f32 1.442695, %v180_v21 }
  0xf1   :  { %v235_v15 = vshrl.u32 %v232_v13, 7  ;;  %v238_v16 = vadd.s32 4294967288, %v233_v14 }
  0xf2   :  { %294 = vrcp.f32 %v153_v18  ;;  %v181_v28 = vmul.f32 1.442695, %v179_v23 }
  0xf3   :  { %296 = vpow2.f32 %v183_v24  ;;  %v236_v17 = vsub.s32 %v233_v14, %v235_v15  ;;  %v241_v18 = vsub.s32 %v238_v16, %v235_v15 }
  0xf4   :  { %298 = vpow2.f32 %v181_v28 }
  0xfd   :  { %v293_v22 = vpop.eup %292 }
  0xfe   :  { %v160_v25 = vmul.f32 1.0614054, %v293_v22 }
  0xff   :  { %v295_v26 = vpop.eup %294 }
 0x100   :  { %v162_v27 = vadd.f32 -1.4531521, %v160_v25  ;;  %v159_v29 = vmul.f32 1.0614054, %v295_v26  ;;  %v297_v43 = vpop.eup %296 }
 0x101   :  { %v299_v47 = vpop.eup %298 }
 0x102   :  { %v164_v30 = vmul.f32 %v293_v22, %v162_v27  ;;  %v161_v31 = vadd.f32 -1.4531521, %v159_v29 }
 0x104   :  { %v166_v32 = vadd.f32 1.4214138, %v164_v30  ;;  %v163_v33 = vmul.f32 %v295_v26, %v161_v31 }
 0x106   :  { %v168_v34 = vmul.f32 %v293_v22, %v166_v32  ;;  %v165_v35 = vadd.f32 1.4214138, %v163_v33 }
 0x108   :  { %v170_v36 = vadd.f32 -0.28449672, %v168_v34  ;;  %v167_v37 = vmul.f32 %v295_v26, %v165_v35 }
 0x10a   :  { %v172_v38 = vmul.f32 %v293_v22, %v170_v36  ;;  %v169_v39 = vadd.f32 -0.28449672, %v167_v37 }
 0x10c   :  { %v174_v40 = vadd.f32 0.2548296, %v172_v38  ;;  %v171_v41 = vmul.f32 %v295_v26, %v169_v39 }
 0x10e   :  { %v176_v42 = vmul.f32 %v293_v22, %v174_v40  ;;  %v173_v44 = vadd.f32 0.2548296, %v171_v41 }
 0x110   :  { %v186_v45 = vmul.f32 %v297_v43, %v176_v42  ;;  %v175_v46 = vmul.f32 %v295_v26, %v173_v44 }
 0x112   :  { %v188_v48 = vsub.f32 1.0, %v186_v45  ;;  %v185_v49 = vmul.f32 %v299_v47, %v175_v46 }
 0x114   :  { %v192_v50 = vsub.f32 0.0, %v188_v48  ;;  %v187_v51 = vsub.f32 1.0, %v185_v49 }
 0x116   :  { %v194_v52 = vsel %vm190_vm1, %v188_v48, %v192_v50  ;;  %v191_v53 = vsub.f32 0.0, %v187_v51 }
 0x117   :  { %v196_v54 = vadd.f32 1.0, %v194_v52 }
 0x118   :  { %v193_v55 = vsel %vm189_vm2, %v187_v51, %v191_v53 }
 0x119   :  { %v195_v58 = vadd.f32 1.0, %v193_v55  ;;  %v198_v60 = vmul.f32 %v196_v54, %v146_v56 }
 0x11b   :  { %v197_v59 = vmul.f32 %v195_v58, %v145_v57  ;;  %v207_v0 = vmul.f32 %v267_v61, %v198_v60 }
 0x11d   :  { %v206_v62 = vmul.f32 %v267_v61, %v197_v59  ;;  %v211_v1 = vsel %vm63_vm0, %v207_v0, 0.0 }
 0x11f   :  { %v208_v63 = vsel %vm63_vm0, %v206_v62, 0.0 }
 0x120   :  { %209 = vadd.xlane.f32.xlu0 %v208_v63 }
 0x124   :  { %212 = vadd.xlane.f32.xlu0 %v211_v1 }
 0x1a9   :  { %v210_v3 = vpop.xlane.xlu0 %209 }
 0x1aa   :  { %v216_v4 = vadd.f32 %v215_v2, %v210_v3 }
 0x1ac   :  { %v268_v5 = vmul.f32 -1.442695, %v216_v4 }
 0x1ad   :  { %v213_v6 = vpop.xlane.xlu0 %212 }
 0x1ae   :  { %300 = vpow2.f32 %v268_v5  ;;  %v217_v7 = vadd.f32 %v215_v2, %v213_v6 }
 0x1b0   :  { %v269_v8 = vmul.f32 -1.442695, %v217_v7 }
 0x1b2   :  { %302 = vpow2.f32 %v269_v8 }
 0x1bb   :  { %v301_v9 = vpop.eup %300 }
 0x1bc   :  { %v224_v10 = vadd.f32 1.0, %v301_v9 }
 0x1be   :  { %304 = vrcp.f32 %v224_v10 }
 0x1bf   :  { %v303_v11 = vpop.eup %302 }
 0x1c0   :  { %v225_v12 = vadd.f32 1.0, %v303_v11 }
 0x1c2   :  { %306 = vrcp.f32 %v225_v12 }
 0x1cb   :  { %v305_v19 = vpop.eup %304 }
 0x1cc   :  { %v237_v21 = vrot.slane %v305_v19, %v236_v17 }
 0x1cf   :  { %v307_v20 = vpop.eup %306 }
 0x1d0   :  { %v242_v22 = vrot.slane %v307_v20, %v241_v18 }
 0x1d2   :  { %v244_v23 = vsel %vm243_vm3, %v242_v22, %v237_v21 }
 0x1d3   :  { %247 = vst.msk [vmem:[#allocation8] sm:$0x1] %vm246_vm4, %v244_v23 }
 0x1d4   :  { %359 = shalt.err (!%p356_p0)
}
 0x1d5   :  { %257 = dma.vmem_to_hbm [thread:$0]  %s255_s4, 16, %s436_s5, [#allocation5]  }
 0x1d6   :  { %372 = dma.done.wait [#allocation5], 16  }
 0x1d7   :  { %373 = vsyncadd [#allocation5], 4294967280 }
 0x1d8   :  { %261 = vsyncpa [#allocation4], 1 }
 0x1d9   :  { %262 = vsyncpa [#allocation7], 1 }
 0x1da   :  { %263 = vsyncpa [#allocation5], 1 }

// kernel: tpu_custom_call.1
= control target key start
LH: loop header
LB: loop body
LE: loop exit
PB: predicated region body
PF: predicated region fallthrough
CT: control target
= control target key end

     0   :  { %11 = vsyncpa [#allocation4], 0  ;;  %s431_s0 = inlined_call_operand.hbm [shape: f32[16,32], index: 0, kind: input, shape index: {}]   ;;  %s432_s1 = inlined_call_operand.hbm [shape: f32[32,32], index: 1, kind: input, shape index: {}]   ;;  %s433_s2 = inlined_call_operand.vmem [shape: f32[1,32], index: 2, kind: input, shape index: {}]   ;;  %s434_s3 = inlined_call_operand.vmem [shape: f32[1,32], index: 3, kind: input, shape index: {}]   ;;  %s435_s4 = inlined_call_operand.<no memory space> [shape: f32[1,1], index: 4, kind: input, shape index: {}]   ;;  %s436_s5 = inlined_call_operand.hbm [shape: f32[1,1,16], index: 5, kind: output, shape index: {}]  }
   0x1   :  { %12 = vsyncpa [#allocation7], 0 }
   0x2   :  { %13 = vsyncpa [#allocation5], 0  ;;  %s374_s18 = smov [#allocation3]  }
   0x3   :  { %s19_s19 = sshll.u32 %s374_s18, 4  ;;  %s20_s19 = int_to_ptr.vmem [resolvable:$true] %s19_s19 }
   0x4   :  { %s316_s20 = scalar_lea.vmem %s20_s19, 256  ;;  %p321_p1 = scmp.lt.s32.totalorder %s20_s19, %s20_s19 }
   0x5   :  { %p317_p0 = scmp.ne.s32.totalorder %s20_s19, %s316_s20  ;;  %p322_p2 = scmp.lt.s32.totalorder %s316_s20, %s316_s20 }
   0x7   :  { %p323_p3 = por %p322_p2, %p321_p1 }
   0x9   :  { %p324_p4 = pnand %p323_p3, %p317_p0 }
   0xb   :  { %327 = shalt.err (!%p324_p4)
}
   0xc   :  { %s375_s21 = smov 128   ;;  %s376_s22 = smov 8  }
   0xd   :  { %25 = dma.hbm_to_vmem [thread:$0]  %s431_s0, 256, %s20_s19, [#allocation4], %s375_s21, %s375_s21, %s376_s22  }
   0xe   :  { %s377_s25 = smov [#allocation6]  }
   0xf   :  { %s31_s26 = sshll.u32 %s377_s25, 4  ;;  %s32_s26 = int_to_ptr.vmem [resolvable:$true] %s31_s26 }
  0x10   :  { %s336_s27 = scalar_lea.vmem %s32_s26, 512  ;;  %p341_p6 = scmp.lt.s32.totalorder %s32_s26, %s32_s26 }
  0x11   :  { %p337_p5 = scmp.ne.s32.totalorder %s32_s26, %s336_s27  ;;  %p342_p7 = scmp.lt.s32.totalorder %s336_s27, %s336_s27 }
  0x13   :  { %p343_p8 = por %p342_p7, %p341_p6 }
  0x15   :  { %p344_p9 = pnand %p343_p8, %p337_p5 }
  0x17   :  { %347 = shalt.err (!%p344_p9)
}
  0x18   :  { %37 = dma.hbm_to_vmem [thread:$0]  %s432_s1, 512, %s32_s26, [#allocation7], %s375_s21, %s375_s21, %s376_s22  }
  0x19   :  { %368 = dma.done.wait [#allocation4], 256  }
  0x1a   :  { %369 = vsyncadd [#allocation4], 4294967040 }
  0x1b   :  { %370 = dma.done.wait [#allocation7], 512  }
  0x1c   :  { %371 = vsyncadd [#allocation7], 4294966784  ;;  %vm63_vm0 = vcmask 261120   ;;  %v55_v0 = vld [vmem:[#allocation6 + $0x18] sm:$0xff]  ;;  %v54_v1 = vld [vmem:[#allocation6 + $0x10] sm:$0xff]  ;;  %vm243_vm3 = vcmask 130112  }
  0x1d   :  { %276 = vmatprep.subr.mxu0 %v55_v0  ;;  %v50_v2 = vld [vmem:[#allocation3] sm:$0xff]  ;;  %v53_v3 = vld [vmem:[#allocation6 + $0x8] sm:$0xff]  ;;  %v52_v4 = vld [vmem:[#allocation6] sm:$0xff]  ;;  %vm246_vm4 = vcmask 122880  }
  0x1e   :  { %277 = vmatpush3.msra.mxu0 %v55_v0  ;;  %284 = vmatprep.mubr.msk.f32.mxu0 %vm63_vm0, %v50_v2  ;;  %v51_v5 = vld [vmem:[#allocation3 + $0x8] sm:$0xff]  ;;  %v264_v6 = vld [vmem:[%s433_s2] ss:$0 sm:$0xff]  ;;  %v215_v2 = vstv %s435_s4 }
  0x1f   :  { %278 = vmatprep.subr.mxu0 %v54_v1  ;;  %v267_v61 = vld [vmem:[%s434_s3] ss:$0 sm:$0xff]  ;;  %s378_s3 = smov [#allocation8]  }
  0x20   :  { %279 = vmatpush3.msra.mxu0 %v54_v1  ;;  %s254_s4 = sshll.u32 %s378_s3, 4  ;;  %s255_s4 = int_to_ptr.vmem [resolvable:$true] %s254_s4 }
  0x21   :  { %280 = vmatprep.subr.mxu0 %v53_v3  ;;  %s348_s8 = scalar_lea.vmem %s255_s4, 16  ;;  %s352_s9 = scalar_lea.vmem %s255_s4, 32 }
  0x22   :  { %281 = vmatpush3.msra.mxu0 %v53_v3  ;;  %p349_p10 = scmp.ne.s32.totalorder %s255_s4, %s348_s8  ;;  %p353_p11 = scmp.lt.s32.totalorder %s255_s4, %s255_s4 }
  0x23   :  { %282 = vmatprep.subr.mxu0 %v52_v4  ;;  %p354_p12 = scmp.lt.s32.totalorder %s352_s9, %s348_s8 }
  0x24   :  { %283 = vmatpush3.msra.mxu0 %v52_v4 }
  0x25   :  { %285 = vmatmul.mubr.msk.f32.vlgmr.msra.gmra.mxu0 %vm63_vm0, %v51_v5  ;;  %p355_p13 = por %p354_p12, %p353_p11 }
  0x27   :  { %p356_p0 = pnand %p355_p13, %p349_p10 }
  0xe5   :  { %v286_v7 = vpop.f32.mrf.mxu0 }
  0xe6   :  { %v142_v8 = vadd.f32 %v286_v7, %v264_v6 }
  0xe7   :  { %v136_v9 = vpop.f32.mrf.mxu0 }
  0xe8   :  { %v148_v10 = vmul.f32 0.70710677, %v142_v8  ;;  %v137_v11 = vadd.f32 %v264_v6, %v136_v9  ;;  %v146_v56 = vmul.f32 0.5, %v142_v8 }
  0xea   :  { %v150_v12 = vand.u32 2147483647, %v148_v10  ;;  %v147_v13 = vmul.f32 0.70710677, %v137_v11  ;;  %vm190_vm1 = vcmp.ge.f32.partialorder %v148_v10, 0.0  ;;  %v145_v57 = vmul.f32 0.5, %v137_v11 }
  0xec   :  { %v152_v14 = vmul.f32 0.3275911, %v150_v12  ;;  %v149_v15 = vand.u32 2147483647, %v147_v13  ;;  %v178_v19 = vsub.f32 0.0, %v150_v12  ;;  %vm189_vm2 = vcmp.ge.f32.partialorder %v147_v13, 0.0 }
  0xed   :  { %v232_v13 = vlaneseq }
  0xee   :  { %v154_v16 = vadd.f32 1.0, %v152_v14  ;;  %v151_v17 = vmul.f32 0.3275911, %v149_v15  ;;  %v177_v20 = vsub.f32 0.0, %v149_v15  ;;  %v180_v21 = vmul.f32 %v178_v19, %v150_v12 }
  0xef   :  { %v233_v14 = vand.u32 127, %v232_v13 }
  0xf0   :  { %292 = vrcp.f32 %v154_v16  ;;  %v153_v18 = vadd.f32 1.0, %v151_v17  ;;  %v179_v23 = vmul.f32 %v177_v20, %v149_v15  ;;  %v183_v24 = vmul.f32 1.442695, %v180_v21 }
  0xf1   :  { %v235_v15 = vshrl.u32 %v232_v13, 7  ;;  %v238_v16 = vadd.s32 4294967288, %v233_v14 }
  0xf2   :  { %294 = vrcp.f32 %v153_v18  ;;  %v181_v28 = vmul.f32 1.442695, %v179_v23 }
  0xf3   :  { %296 = vpow2.f32 %v183_v24  ;;  %v236_v17 = vsub.s32 %v233_v14, %v235_v15  ;;  %v241_v18 = vsub.s32 %v238_v16, %v235_v15 }
  0xf4   :  { %298 = vpow2.f32 %v181_v28 }
  0xfd   :  { %v293_v22 = vpop.eup %292 }
  0xfe   :  { %v160_v25 = vmul.f32 1.0614054, %v293_v22 }
  0xff   :  { %v295_v26 = vpop.eup %294 }
 0x100   :  { %v162_v27 = vadd.f32 -1.4531521, %v160_v25  ;;  %v159_v29 = vmul.f32 1.0614054, %v295_v26  ;;  %v297_v43 = vpop.eup %296 }
 0x101   :  { %v299_v47 = vpop.eup %298 }
 0x102   :  { %v164_v30 = vmul.f32 %v293_v22, %v162_v27  ;;  %v161_v31 = vadd.f32 -1.4531521, %v159_v29 }
 0x104   :  { %v166_v32 = vadd.f32 1.4214138, %v164_v30  ;;  %v163_v33 = vmul.f32 %v295_v26, %v161_v31 }
 0x106   :  { %v168_v34 = vmul.f32 %v293_v22, %v166_v32  ;;  %v165_v35 = vadd.f32 1.4214138, %v163_v33 }
 0x108   :  { %v170_v36 = vadd.f32 -0.28449672, %v168_v34  ;;  %v167_v37 = vmul.f32 %v295_v26, %v165_v35 }
 0x10a   :  { %v172_v38 = vmul.f32 %v293_v22, %v170_v36  ;;  %v169_v39 = vadd.f32 -0.28449672, %v167_v37 }
 0x10c   :  { %v174_v40 = vadd.f32 0.2548296, %v172_v38  ;;  %v171_v41 = vmul.f32 %v295_v26, %v169_v39 }
 0x10e   :  { %v176_v42 = vmul.f32 %v293_v22, %v174_v40  ;;  %v173_v44 = vadd.f32 0.2548296, %v171_v41 }
 0x110   :  { %v186_v45 = vmul.f32 %v297_v43, %v176_v42  ;;  %v175_v46 = vmul.f32 %v295_v26, %v173_v44 }
 0x112   :  { %v188_v48 = vsub.f32 1.0, %v186_v45  ;;  %v185_v49 = vmul.f32 %v299_v47, %v175_v46 }
 0x114   :  { %v192_v50 = vsub.f32 0.0, %v188_v48  ;;  %v187_v51 = vsub.f32 1.0, %v185_v49 }
 0x116   :  { %v194_v52 = vsel %vm190_vm1, %v188_v48, %v192_v50  ;;  %v191_v53 = vsub.f32 0.0, %v187_v51 }
 0x117   :  { %v196_v54 = vadd.f32 1.0, %v194_v52 }
 0x118   :  { %v193_v55 = vsel %vm189_vm2, %v187_v51, %v191_v53 }
 0x119   :  { %v195_v58 = vadd.f32 1.0, %v193_v55  ;;  %v198_v60 = vmul.f32 %v196_v54, %v146_v56 }
 0x11b   :  { %v197_v59 = vmul.f32 %v195_v58, %v145_v57  ;;  %v207_v0 = vmul.f32 %v267_v61, %v198_v60 }
 0x11d   :  { %v206_v62 = vmul.f32 %v267_v61, %v197_v59  ;;  %v211_v1 = vsel %vm63_vm0, %v207_v0, 0.0 }
 0x11f   :  { %v208_v63 = vsel %vm63_vm0, %v206_v62, 0.0 }
 0x120   :  { %209 = vadd.xlane.f32.xlu0 %v208_v63 }
 0x124   :  { %212 = vadd.xlane.f32.xlu0 %v211_v1 }
 0x1a9   :  { %v210_v3 = vpop.xlane.xlu0 %209 }
 0x1aa   :  { %v216_v4 = vadd.f32 %v215_v2, %v210_v3 }
 0x1ac   :  { %v268_v5 = vmul.f32 -1.442695, %v216_v4 }
 0x1ad   :  { %v213_v6 = vpop.xlane.xlu0 %212 }
 0x1ae   :  { %300 = vpow2.f32 %v268_v5  ;;  %v217_v7 = vadd.f32 %v215_v2, %v213_v6 }
 0x1b0   :  { %v269_v8 = vmul.f32 -1.442695, %v217_v7 }
 0x1b2   :  { %302 = vpow2.f32 %v269_v8 }
 0x1bb   :  { %v301_v9 = vpop.eup %300 }
 0x1bc   :  { %v224_v10 = vadd.f32 1.0, %v301_v9 }
 0x1be   :  { %304 = vrcp.f32 %v224_v10 }
 0x1bf   :  { %v303_v11 = vpop.eup %302 }
 0x1c0   :  { %v225_v12 = vadd.f32 1.0, %v303_v11 }
 0x1c2   :  { %306 = vrcp.f32 %v225_v12 }
 0x1cb   :  { %v305_v19 = vpop.eup %304 }
 0x1cc   :  { %v237_v21 = vrot.slane %v305_v19, %v236_v17 }
 0x1cf   :  { %v307_v20 = vpop.eup %306 }
 0x1d0   :  { %v242_v22 = vrot.slane %v307_v20, %v241_v18 }
 0x1d2   :  { %v244_v23 = vsel %vm243_vm3, %v242_v22, %v237_v21 }
 0x1d3   :  { %247 = vst.msk [vmem:[#allocation8] sm:$0x1] %vm246_vm4, %v244_v23 }
 0x1d4   :  { %359 = shalt.err (!%p356_p0)
}
 0x1d5   :  { %257 = dma.vmem_to_hbm [thread:$0]  %s255_s4, 16, %s436_s5, [#allocation5]  }
 0x1d6   :  { %372 = dma.done.wait [#allocation5], 16  }
 0x1d7   :  { %373 = vsyncadd [#allocation5], 4294967280 }
 0x1d8   :  { %261 = vsyncpa [#allocation4], 1 }
 0x1d9   :  { %262 = vsyncpa [#allocation7], 1 }
 0x1da   :  { %263 = vsyncpa [#allocation5], 1 }

</bundles_post_ra>
